<compile_context>
chip_gen: v6e
topology: v6e:2x2x1
jax: 0.10.0
libtpu: 0.0.40
codegen_flags: <defaults>
</compile_context>

<pallas_src>
import functools
import math

import jax
import jax.numpy as jnp
from jax.experimental import pallas as pl
from jax.experimental.pallas import tpu as pltpu


def _mha_kernel(q_ref, k_ref, v_ref, mask_ref,
                wq_ref, bq_ref, wk_ref, bk_ref, wv_ref, bv_ref,
                wo_ref, bo_ref, o_ref, *, num_heads, head_dim):
    # q/k/v_ref: (1, S, H)   mask_ref: (1, S, 1)   w*_ref: (H, H)   b*_ref: (1, H)
    S = q_ref.shape[1]
    H = q_ref.shape[2]
    scale = 1.0 / math.sqrt(head_dim)

    q = q_ref[0].astype(jnp.float32)             # (S, H)
    k = k_ref[0].astype(jnp.float32)             # (S, H)
    v = v_ref[0].astype(jnp.float32)             # (S, H)
    qmask = mask_ref[0]                          # (S, 1); 0.0 => masked query row

    wq = wq_ref[...]
    wk = wk_ref[...]
    wv = wv_ref[...]
    wo = wo_ref[...]

    # Input projections on the MXU with f32 accumulation.
    qp = jnp.dot(q, wq, preferred_element_type=jnp.float32) + bq_ref[...]
    kp = jnp.dot(k, wk, preferred_element_type=jnp.float32) + bk_ref[...]
    vp = jnp.dot(v, wv, preferred_element_type=jnp.float32) + bv_ref[...]

    # Additive row-mask bias (PyTorch masks whole query rows), hoisted out of
    # the per-head loop.  Broadcasts (S, 1) over keys.
    mask_bias = jnp.where(qmask == 0.0, jnp.float32(-1e9), jnp.float32(0.0))

    # Seed the accumulator with the output-projection bias so the epilogue is
    # just a cast + store.
    acc = jnp.broadcast_to(bo_ref[...], (S, H)).astype(jnp.float32)

    # Per-head attention; accumulate each head's output-projection contribution
    # instead of concatenating heads (no relayout / concat needed).
    for h in range(num_heads):
        lo = h * head_dim
        hi = lo + head_dim
        qh = qp[:, lo:hi]                        # (S, dh)
        kh = kp[:, lo:hi]                        # (S, dh)
        vh = vp[:, lo:hi]                        # (S, dh)

        # scores = qh @ kh^T (contract last dims; no explicit transpose).
        s = jax.lax.dot_general(
            qh, kh, (((1,), (1,)), ((), ())),
            preferred_element_type=jnp.float32) * scale        # (S, S)
        s = s + mask_bias

        # Numerically stable softmax over keys.
        m = jnp.max(s, axis=-1, keepdims=True)
        e = jnp.exp(s - m)
        p = e / jnp.sum(e, axis=-1, keepdims=True)

        ctx = jnp.dot(p, vh, preferred_element_type=jnp.float32)   # (S, dh)
        acc = acc + jnp.dot(ctx, wo[lo:hi, :],
                            preferred_element_type=jnp.float32)    # (S, H)

    o_ref[0] = acc.astype(o_ref.dtype)


def multi_headed_attention(q, k, v, wq, bq, wk, bk, wv, bv, wo, bo,
                           *, num_heads, mask=None):
    """q,k,v: [B,S,H]; w*: [H,H] (x @ W + b layout); b*: [H]; mask: [B,S] or None."""
    B, S, H = q.shape
    assert H % num_heads == 0
    head_dim = H // num_heads

    if mask is None:
        mask = jnp.ones((B, S), jnp.float32)
    # Mask as a (B, S, 1) column so it broadcasts over keys inside the kernel.
    mask_col = mask.astype(jnp.float32).reshape(B, S, 1)

    f32 = jnp.float32
    q32, k32, v32 = q.astype(f32), k.astype(f32), v.astype(f32)
    wq32, wk32 = wq.astype(f32), wk.astype(f32)
    wv32, wo32 = wv.astype(f32), wo.astype(f32)
    bq2 = bq.astype(f32).reshape(1, H)
    bk2 = bk.astype(f32).reshape(1, H)
    bv2 = bv.astype(f32).reshape(1, H)
    bo2 = bo.astype(f32).reshape(1, H)

    kernel = functools.partial(_mha_kernel, num_heads=num_heads, head_dim=head_dim)

    act_spec = pl.BlockSpec((1, S, H), lambda b: (b, 0, 0))
    w_spec = pl.BlockSpec((H, H), lambda b: (0, 0))
    b_spec = pl.BlockSpec((1, H), lambda b: (0, 0))

    out = pl.pallas_call(
        kernel,
        out_shape=jax.ShapeDtypeStruct((B, S, H), q.dtype),
        grid_spec=pltpu.PrefetchScalarGridSpec(
            num_scalar_prefetch=0,
            grid=(B,),
            in_specs=[
                act_spec,                                      # q
                act_spec,                                      # k
                act_spec,                                      # v
                pl.BlockSpec((1, S, 1), lambda b: (b, 0, 0)),  # mask column
                w_spec, b_spec,                                # wq, bq
                w_spec, b_spec,                                # wk, bk
                w_spec, b_spec,                                # wv, bv
                w_spec, b_spec,                                # wo, bo
            ],
            out_specs=act_spec,
        ),
        compiler_params=pltpu.CompilerParams(
            dimension_semantics=("parallel",)),
    )(q32, k32, v32, mask_col, wq32, bq2, wk32, bk2, wv32, bv2, wo32, bo2)

    return out


def mha_ref(q, k, v, wq, bq, wk, bk, wv, bv, wo, bo, mask, num_heads):
    """Pure-JAX reference matching the PyTorch forward (eval mode, same weight layout)."""
    B, S, H = q.shape
    dh = H // num_heads

    def proj(x, w, b):
        return jnp.matmul(x, w) + b

    qp = proj(q, wq, bq).reshape(B, S, num_heads, dh).transpose(0, 2, 1, 3)
    kp = proj(k, wk, bk).reshape(B, S, num_heads, dh).transpose(0, 2, 1, 3)
    vp = proj(v, wv, bv).reshape(B, S, num_heads, dh).transpose(0, 2, 1, 3)

    corr = jnp.einsum("bhqd,bhkd->bhqk", qp, kp) / math.sqrt(dh)
    if mask is not None:
        m = mask[:, None, :, None]                      # [B,1,S,1] -> query-row mask
        corr = jnp.where(m == 0, -1e9, corr)
    p = jax.nn.softmax(corr, axis=-1)
    hid = jnp.einsum("bhqk,bhkd->bhqd", p, vp)
    hid = hid.transpose(0, 2, 1, 3).reshape(B, S, H)
    return jnp.matmul(hid, wo) + bo


def _init_linear(key, h):
    kw, kb = jax.random.split(key)
    w = jax.random.normal(kw, (h, h), jnp.float32) * (1.0 / math.sqrt(h))
    b = jax.random.normal(kb, (h,), jnp.float32) * 0.01
    return w, b


if __name__ == "__main__":
    heads, hidden = 4, 32           # hidden % heads == 0, head_dim = 8
    B, S = 2, 8

    key = jax.random.PRNGKey(0)
    kq, kk, kv, kwq, kwk, kwv, kwo, kmask = jax.random.split(key, 8)

    q = jax.random.normal(kq, (B, S, hidden), jnp.float32)
    k = jax.random.normal(kk, (B, S, hidden), jnp.float32)
    v = jax.random.normal(kv, (B, S, hidden), jnp.float32)

    wq, bq = _init_linear(kwq, hidden)
    wk, bk = _init_linear(kwk, hidden)
    wv, bv = _init_linear(kwv, hidden)
    wo, bo = _init_linear(kwo, hidden)

    # Padding-style mask over query positions (1 = keep, 0 = masked), as in the module.
    mask = (jax.random.uniform(kmask, (B, S)) > 0.25).astype(jnp.float32)

    out = multi_headed_attention(q, k, v, wq, bq, wk, bk, wv, bv, wo, bo,
                                 num_heads=heads, mask=mask)
    out = jax.block_until_ready(out)

    ref = mha_ref(q, k, v, wq, bq, wk, bk, wv, bv, wo, bo, mask, heads)
    assert out.shape == (B, S, hidden)
    assert jnp.allclose(out, ref, atol=1e-4, rtol=1e-4), "mismatch vs reference"

    print("KERNEL_OK")
</pallas_src>

<mosaic_0001>
module attributes {stable_mosaic.version = 11 : i64} {
  func.func @_mha_kernel(%arg0: i32, %arg1: memref<1x8x32xf32, #tpu.memory_space<vmem>>, %arg2: memref<1x8x32xf32, #tpu.memory_space<vmem>>, %arg3: memref<1x8x32xf32, #tpu.memory_space<vmem>>, %arg4: memref<1x8x1xf32, #tpu.memory_space<vmem>>, %arg5: memref<32x32xf32, #tpu.memory_space<vmem>>, %arg6: memref<1x32xf32, #tpu.memory_space<vmem>>, %arg7: memref<32x32xf32, #tpu.memory_space<vmem>>, %arg8: memref<1x32xf32, #tpu.memory_space<vmem>>, %arg9: memref<32x32xf32, #tpu.memory_space<vmem>>, %arg10: memref<1x32xf32, #tpu.memory_space<vmem>>, %arg11: memref<32x32xf32, #tpu.memory_space<vmem>>, %arg12: memref<1x32xf32, #tpu.memory_space<vmem>>, %arg13: memref<1x8x32xf32, #tpu.memory_space<vmem>>) attributes {dimension_semantics = [#tpu.dimension_semantics<parallel>], iteration_bounds = array<i64: 2>, scalar_prefetch = 0 : i64, scratch_operands = 0 : i64, tpu.core_type = #tpu.core_type<tc>, window_params = [{transform_indices = @transform_0, window_bounds = array<i64: 1, 8, 32>}, {transform_indices = @transform_1, window_bounds = array<i64: 1, 8, 32>}, {transform_indices = @transform_2, window_bounds = array<i64: 1, 8, 32>}, {transform_indices = @transform_3, window_bounds = array<i64: 1, 8, 1>}, {pipeline_mode = #tpu.pipeline_mode<synchronous>, transform_indices = @transform_4, window_bounds = array<i64: 32, 32>}, {pipeline_mode = #tpu.pipeline_mode<synchronous>, transform_indices = @transform_5, window_bounds = array<i64: 1, 32>}, {pipeline_mode = #tpu.pipeline_mode<synchronous>, transform_indices = @transform_6, window_bounds = array<i64: 32, 32>}, {pipeline_mode = #tpu.pipeline_mode<synchronous>, transform_indices = @transform_7, window_bounds = array<i64: 1, 32>}, {pipeline_mode = #tpu.pipeline_mode<synchronous>, transform_indices = @transform_8, window_bounds = array<i64: 32, 32>}, {pipeline_mode = #tpu.pipeline_mode<synchronous>, transform_indices = @transform_9, window_bounds = array<i64: 1, 32>}, {pipeline_mode = #tpu.pipeline_mode<synchronous>, transform_indices = @transform_10, window_bounds = array<i64: 32, 32>}, {pipeline_mode = #tpu.pipeline_mode<synchronous>, transform_indices = @transform_11, window_bounds = array<i64: 1, 32>}, {transform_indices = @transform_12, window_bounds = array<i64: 1, 8, 32>}]} {
    %c0 = arith.constant 0 : index
    %c0_0 = arith.constant 0 : index
    %c0_1 = arith.constant 0 : index
    %0 = vector.load %arg1[%c0, %c0_0, %c0_1] : memref<1x8x32xf32, #tpu.memory_space<vmem>>, vector<1x8x32xf32>
    %1 = vector.shape_cast %0 : vector<1x8x32xf32> to vector<8x32xf32>
    %c0_2 = arith.constant 0 : index
    %c0_3 = arith.constant 0 : index
    %c0_4 = arith.constant 0 : index
    %2 = vector.load %arg2[%c0_2, %c0_3, %c0_4] : memref<1x8x32xf32, #tpu.memory_space<vmem>>, vector<1x8x32xf32>
    %3 = vector.shape_cast %2 : vector<1x8x32xf32> to vector<8x32xf32>
    %c0_5 = arith.constant 0 : index
    %c0_6 = arith.constant 0 : index
    %c0_7 = arith.constant 0 : index
    %4 = vector.load %arg3[%c0_5, %c0_6, %c0_7] : memref<1x8x32xf32, #tpu.memory_space<vmem>>, vector<1x8x32xf32>
    %5 = vector.shape_cast %4 : vector<1x8x32xf32> to vector<8x32xf32>
    %c0_8 = arith.constant 0 : index
    %c0_9 = arith.constant 0 : index
    %c0_10 = arith.constant 0 : index
    %6 = vector.load %arg4[%c0_8, %c0_9, %c0_10] : memref<1x8x1xf32, #tpu.memory_space<vmem>>, vector<1x8x1xf32>
    %7 = vector.shape_cast %6 : vector<1x8x1xf32> to vector<8x1xf32>
    %c0_11 = arith.constant 0 : index
    %c0_12 = arith.constant 0 : index
    %8 = vector.load %arg5[%c0_11, %c0_12] : memref<32x32xf32, #tpu.memory_space<vmem>>, vector<32x32xf32>
    %c0_13 = arith.constant 0 : index
    %c0_14 = arith.constant 0 : index
    %9 = vector.load %arg7[%c0_13, %c0_14] : memref<32x32xf32, #tpu.memory_space<vmem>>, vector<32x32xf32>
    %c0_15 = arith.constant 0 : index
    %c0_16 = arith.constant 0 : index
    %10 = vector.load %arg9[%c0_15, %c0_16] : memref<32x32xf32, #tpu.memory_space<vmem>>, vector<32x32xf32>
    %c0_17 = arith.constant 0 : index
    %c0_18 = arith.constant 0 : index
    %11 = vector.load %arg11[%c0_17, %c0_18] : memref<32x32xf32, #tpu.memory_space<vmem>>, vector<32x32xf32>
    %cst = arith.constant dense<0.000000e+00> : vector<8x32xf32>
    %12 = tpu.matmul %1, %8, %cst {dimension_numbers = #tpu.dot_dimension_numbers<[1], [0], [0], [1], [0, 0, 1, 1], [], []>} : vector<8x32xf32>, vector<32x32xf32>, vector<8x32xf32> -> vector<8x32xf32>
    %c0_19 = arith.constant 0 : index
    %c0_20 = arith.constant 0 : index
    %13 = vector.load %arg6[%c0_19, %c0_20] : memref<1x32xf32, #tpu.memory_space<vmem>>, vector<1x32xf32>
    %14 = vector.broadcast %13 : vector<1x32xf32> to vector<8x32xf32>
    %15 = arith.addf %12, %14 : vector<8x32xf32>
    %cst_21 = arith.constant dense<0.000000e+00> : vector<8x32xf32>
    %16 = tpu.matmul %3, %9, %cst_21 {dimension_numbers = #tpu.dot_dimension_numbers<[1], [0], [0], [1], [0, 0, 1, 1], [], []>} : vector<8x32xf32>, vector<32x32xf32>, vector<8x32xf32> -> vector<8x32xf32>
    %c0_22 = arith.constant 0 : index
    %c0_23 = arith.constant 0 : index
    %17 = vector.load %arg8[%c0_22, %c0_23] : memref<1x32xf32, #tpu.memory_space<vmem>>, vector<1x32xf32>
    %18 = vector.broadcast %17 : vector<1x32xf32> to vector<8x32xf32>
    %19 = arith.addf %16, %18 : vector<8x32xf32>
    %cst_24 = arith.constant dense<0.000000e+00> : vector<8x32xf32>
    %20 = tpu.matmul %5, %10, %cst_24 {dimension_numbers = #tpu.dot_dimension_numbers<[1], [0], [0], [1], [0, 0, 1, 1], [], []>} : vector<8x32xf32>, vector<32x32xf32>, vector<8x32xf32> -> vector<8x32xf32>
    %c0_25 = arith.constant 0 : index
    %c0_26 = arith.constant 0 : index
    %21 = vector.load %arg10[%c0_25, %c0_26] : memref<1x32xf32, #tpu.memory_space<vmem>>, vector<1x32xf32>
    %22 = vector.broadcast %21 : vector<1x32xf32> to vector<8x32xf32>
    %23 = arith.addf %20, %22 : vector<8x32xf32>
    %cst_27 = arith.constant 0.000000e+00 : f32
    %24 = vector.broadcast %cst_27 : f32 to vector<8x1xf32>
    %25 = arith.cmpf oeq, %7, %24 : vector<8x1xf32>
    %cst_28 = arith.constant -1.000000e+09 : f32
    %cst_29 = arith.constant 0.000000e+00 : f32
    %26 = vector.broadcast %cst_28 : f32 to vector<8x1xf32>
    %27 = vector.broadcast %cst_29 : f32 to vector<8x1xf32>
    %28 = arith.select %25, %26, %27 : vector<8x1xi1>, vector<8x1xf32>
    %c0_30 = arith.constant 0 : index
    %c0_31 = arith.constant 0 : index
    %29 = vector.load %arg12[%c0_30, %c0_31] : memref<1x32xf32, #tpu.memory_space<vmem>>, vector<1x32xf32>
    %30 = vector.shape_cast %29 : vector<1x32xf32> to vector<1x32xf32>
    %31 = vector.broadcast %30 : vector<1x32xf32> to vector<8x32xf32>
    %32 = vector.extract_strided_slice %15 {offsets = [0, 0], sizes = [8, 8], strides = [1, 1]} : vector<8x32xf32> to vector<8x8xf32>
    %33 = vector.extract_strided_slice %19 {offsets = [0, 0], sizes = [8, 8], strides = [1, 1]} : vector<8x32xf32> to vector<8x8xf32>
    %34 = vector.extract_strided_slice %23 {offsets = [0, 0], sizes = [8, 8], strides = [1, 1]} : vector<8x32xf32> to vector<8x8xf32>
    %cst_32 = arith.constant dense<0.000000e+00> : vector<8x8xf32>
    %35 = tpu.matmul %32, %33, %cst_32 {dimension_numbers = #tpu.dot_dimension_numbers<[1], [1], [0], [0], [0, 0, 1, 0], [], []>} : vector<8x8xf32>, vector<8x8xf32>, vector<8x8xf32> -> vector<8x8xf32>
    %cst_33 = arith.constant 0.353553385 : f32
    %36 = vector.broadcast %cst_33 : f32 to vector<8x8xf32>
    %37 = arith.mulf %35, %36 : vector<8x8xf32>
    %38 = vector.broadcast %28 : vector<8x1xf32> to vector<8x8xf32>
    %39 = arith.addf %37, %38 : vector<8x8xf32>
    %cst_34 = arith.constant dense<0xFF800000> : vector<8xf32>
    %40 = vector.multi_reduction <maximumf>, %39, %cst_34 [1] : vector<8x8xf32> to vector<8xf32>
    %41 = vector.shape_cast %40 : vector<8xf32> to vector<8x1xf32>
    %42 = vector.broadcast %41 : vector<8x1xf32> to vector<8x8xf32>
    %43 = arith.subf %39, %42 : vector<8x8xf32>
    %44 = math.exp %43 : vector<8x8xf32>
    %cst_35 = arith.constant dense<0.000000e+00> : vector<8xf32>
    %45 = vector.multi_reduction <add>, %44, %cst_35 [1] : vector<8x8xf32> to vector<8xf32>
    %46 = vector.shape_cast %45 : vector<8xf32> to vector<8x1xf32>
    %47 = vector.broadcast %46 : vector<8x1xf32> to vector<8x8xf32>
    %48 = arith.divf %44, %47 : vector<8x8xf32>
    %cst_36 = arith.constant dense<0.000000e+00> : vector<8x8xf32>
    %49 = tpu.matmul %48, %34, %cst_36 {dimension_numbers = #tpu.dot_dimension_numbers<[1], [0], [0], [1], [0, 0, 1, 1], [], []>} : vector<8x8xf32>, vector<8x8xf32>, vector<8x8xf32> -> vector<8x8xf32>
    %50 = vector.extract_strided_slice %11 {offsets = [0, 0], sizes = [8, 32], strides = [1, 1]} : vector<32x32xf32> to vector<8x32xf32>
    %cst_37 = arith.constant dense<0.000000e+00> : vector<8x32xf32>
    %51 = tpu.matmul %49, %50, %cst_37 {dimension_numbers = #tpu.dot_dimension_numbers<[1], [0], [0], [1], [0, 0, 1, 1], [], []>} : vector<8x8xf32>, vector<8x32xf32>, vector<8x32xf32> -> vector<8x32xf32>
    %52 = arith.addf %31, %51 : vector<8x32xf32>
    %53 = vector.extract_strided_slice %15 {offsets = [0, 8], sizes = [8, 8], strides = [1, 1]} : vector<8x32xf32> to vector<8x8xf32>
    %54 = vector.extract_strided_slice %19 {offsets = [0, 8], sizes = [8, 8], strides = [1, 1]} : vector<8x32xf32> to vector<8x8xf32>
    %55 = vector.extract_strided_slice %23 {offsets = [0, 8], sizes = [8, 8], strides = [1, 1]} : vector<8x32xf32> to vector<8x8xf32>
    %cst_38 = arith.constant dense<0.000000e+00> : vector<8x8xf32>
    %56 = tpu.matmul %53, %54, %cst_38 {dimension_numbers = #tpu.dot_dimension_numbers<[1], [1], [0], [0], [0, 0, 1, 0], [], []>} : vector<8x8xf32>, vector<8x8xf32>, vector<8x8xf32> -> vector<8x8xf32>
    %cst_39 = arith.constant 0.353553385 : f32
    %57 = vector.broadcast %cst_39 : f32 to vector<8x8xf32>
    %58 = arith.mulf %56, %57 : vector<8x8xf32>
    %59 = vector.broadcast %28 : vector<8x1xf32> to vector<8x8xf32>
    %60 = arith.addf %58, %59 : vector<8x8xf32>
    %cst_40 = arith.constant dense<0xFF800000> : vector<8xf32>
    %61 = vector.multi_reduction <maximumf>, %60, %cst_40 [1] : vector<8x8xf32> to vector<8xf32>
    %62 = vector.shape_cast %61 : vector<8xf32> to vector<8x1xf32>
    %63 = vector.broadcast %62 : vector<8x1xf32> to vector<8x8xf32>
    %64 = arith.subf %60, %63 : vector<8x8xf32>
    %65 = math.exp %64 : vector<8x8xf32>
    %cst_41 = arith.constant dense<0.000000e+00> : vector<8xf32>
    %66 = vector.multi_reduction <add>, %65, %cst_41 [1] : vector<8x8xf32> to vector<8xf32>
    %67 = vector.shape_cast %66 : vector<8xf32> to vector<8x1xf32>
    %68 = vector.broadcast %67 : vector<8x1xf32> to vector<8x8xf32>
    %69 = arith.divf %65, %68 : vector<8x8xf32>
    %cst_42 = arith.constant dense<0.000000e+00> : vector<8x8xf32>
    %70 = tpu.matmul %69, %55, %cst_42 {dimension_numbers = #tpu.dot_dimension_numbers<[1], [0], [0], [1], [0, 0, 1, 1], [], []>} : vector<8x8xf32>, vector<8x8xf32>, vector<8x8xf32> -> vector<8x8xf32>
    %71 = vector.extract_strided_slice %11 {offsets = [8, 0], sizes = [8, 32], strides = [1, 1]} : vector<32x32xf32> to vector<8x32xf32>
    %cst_43 = arith.constant dense<0.000000e+00> : vector<8x32xf32>
    %72 = tpu.matmul %70, %71, %cst_43 {dimension_numbers = #tpu.dot_dimension_numbers<[1], [0], [0], [1], [0, 0, 1, 1], [], []>} : vector<8x8xf32>, vector<8x32xf32>, vector<8x32xf32> -> vector<8x32xf32>
    %73 = arith.addf %52, %72 : vector<8x32xf32>
    %74 = vector.extract_strided_slice %15 {offsets = [0, 16], sizes = [8, 8], strides = [1, 1]} : vector<8x32xf32> to vector<8x8xf32>
    %75 = vector.extract_strided_slice %19 {offsets = [0, 16], sizes = [8, 8], strides = [1, 1]} : vector<8x32xf32> to vector<8x8xf32>
    %76 = vector.extract_strided_slice %23 {offsets = [0, 16], sizes = [8, 8], strides = [1, 1]} : vector<8x32xf32> to vector<8x8xf32>
    %cst_44 = arith.constant dense<0.000000e+00> : vector<8x8xf32>
    %77 = tpu.matmul %74, %75, %cst_44 {dimension_numbers = #tpu.dot_dimension_numbers<[1], [1], [0], [0], [0, 0, 1, 0], [], []>} : vector<8x8xf32>, vector<8x8xf32>, vector<8x8xf32> -> vector<8x8xf32>
    %cst_45 = arith.constant 0.353553385 : f32
    %78 = vector.broadcast %cst_45 : f32 to vector<8x8xf32>
    %79 = arith.mulf %77, %78 : vector<8x8xf32>
    %80 = vector.broadcast %28 : vector<8x1xf32> to vector<8x8xf32>
    %81 = arith.addf %79, %80 : vector<8x8xf32>
    %cst_46 = arith.constant dense<0xFF800000> : vector<8xf32>
    %82 = vector.multi_reduction <maximumf>, %81, %cst_46 [1] : vector<8x8xf32> to vector<8xf32>
    %83 = vector.shape_cast %82 : vector<8xf32> to vector<8x1xf32>
    %84 = vector.broadcast %83 : vector<8x1xf32> to vector<8x8xf32>
    %85 = arith.subf %81, %84 : vector<8x8xf32>
    %86 = math.exp %85 : vector<8x8xf32>
    %cst_47 = arith.constant dense<0.000000e+00> : vector<8xf32>
    %87 = vector.multi_reduction <add>, %86, %cst_47 [1] : vector<8x8xf32> to vector<8xf32>
    %88 = vector.shape_cast %87 : vector<8xf32> to vector<8x1xf32>
    %89 = vector.broadcast %88 : vector<8x1xf32> to vector<8x8xf32>
    %90 = arith.divf %86, %89 : vector<8x8xf32>
    %cst_48 = arith.constant dense<0.000000e+00> : vector<8x8xf32>
    %91 = tpu.matmul %90, %76, %cst_48 {dimension_numbers = #tpu.dot_dimension_numbers<[1], [0], [0], [1], [0, 0, 1, 1], [], []>} : vector<8x8xf32>, vector<8x8xf32>, vector<8x8xf32> -> vector<8x8xf32>
    %92 = vector.extract_strided_slice %11 {offsets = [16, 0], sizes = [8, 32], strides = [1, 1]} : vector<32x32xf32> to vector<8x32xf32>
    %cst_49 = arith.constant dense<0.000000e+00> : vector<8x32xf32>
    %93 = tpu.matmul %91, %92, %cst_49 {dimension_numbers = #tpu.dot_dimension_numbers<[1], [0], [0], [1], [0, 0, 1, 1], [], []>} : vector<8x8xf32>, vector<8x32xf32>, vector<8x32xf32> -> vector<8x32xf32>
    %94 = arith.addf %73, %93 : vector<8x32xf32>
    %95 = vector.extract_strided_slice %15 {offsets = [0, 24], sizes = [8, 8], strides = [1, 1]} : vector<8x32xf32> to vector<8x8xf32>
    %96 = vector.extract_strided_slice %19 {offsets = [0, 24], sizes = [8, 8], strides = [1, 1]} : vector<8x32xf32> to vector<8x8xf32>
    %97 = vector.extract_strided_slice %23 {offsets = [0, 24], sizes = [8, 8], strides = [1, 1]} : vector<8x32xf32> to vector<8x8xf32>
    %cst_50 = arith.constant dense<0.000000e+00> : vector<8x8xf32>
    %98 = tpu.matmul %95, %96, %cst_50 {dimension_numbers = #tpu.dot_dimension_numbers<[1], [1], [0], [0], [0, 0, 1, 0], [], []>} : vector<8x8xf32>, vector<8x8xf32>, vector<8x8xf32> -> vector<8x8xf32>
    %cst_51 = arith.constant 0.353553385 : f32
    %99 = vector.broadcast %cst_51 : f32 to vector<8x8xf32>
    %100 = arith.mulf %98, %99 : vector<8x8xf32>
    %101 = vector.broadcast %28 : vector<8x1xf32> to vector<8x8xf32>
    %102 = arith.addf %100, %101 : vector<8x8xf32>
    %cst_52 = arith.constant dense<0xFF800000> : vector<8xf32>
    %103 = vector.multi_reduction <maximumf>, %102, %cst_52 [1] : vector<8x8xf32> to vector<8xf32>
    %104 = vector.shape_cast %103 : vector<8xf32> to vector<8x1xf32>
    %105 = vector.broadcast %104 : vector<8x1xf32> to vector<8x8xf32>
    %106 = arith.subf %102, %105 : vector<8x8xf32>
    %107 = math.exp %106 : vector<8x8xf32>
    %cst_53 = arith.constant dense<0.000000e+00> : vector<8xf32>
    %108 = vector.multi_reduction <add>, %107, %cst_53 [1] : vector<8x8xf32> to vector<8xf32>
    %109 = vector.shape_cast %108 : vector<8xf32> to vector<8x1xf32>
    %110 = vector.broadcast %109 : vector<8x1xf32> to vector<8x8xf32>
    %111 = arith.divf %107, %110 : vector<8x8xf32>
    %cst_54 = arith.constant dense<0.000000e+00> : vector<8x8xf32>
    %112 = tpu.matmul %111, %97, %cst_54 {dimension_numbers = #tpu.dot_dimension_numbers<[1], [0], [0], [1], [0, 0, 1, 1], [], []>} : vector<8x8xf32>, vector<8x8xf32>, vector<8x8xf32> -> vector<8x8xf32>
    %113 = vector.extract_strided_slice %11 {offsets = [24, 0], sizes = [8, 32], strides = [1, 1]} : vector<32x32xf32> to vector<8x32xf32>
    %cst_55 = arith.constant dense<0.000000e+00> : vector<8x32xf32>
    %114 = tpu.matmul %112, %113, %cst_55 {dimension_numbers = #tpu.dot_dimension_numbers<[1], [0], [0], [1], [0, 0, 1, 1], [], []>} : vector<8x8xf32>, vector<8x32xf32>, vector<8x32xf32> -> vector<8x32xf32>
    %115 = arith.addf %94, %114 : vector<8x32xf32>
    %c0_56 = arith.constant 0 : index
    %c0_57 = arith.constant 0 : index
    %c0_58 = arith.constant 0 : index
    %116 = vector.load %arg13[%c0_56, %c0_57, %c0_58] : memref<1x8x32xf32, #tpu.memory_space<vmem>>, vector<1x8x32xf32>
    %117 = vector.shape_cast %116 : vector<1x8x32xf32> to vector<8x32xf32>
    %118 = vector.shape_cast %115 : vector<8x32xf32> to vector<1x8x32xf32>
    tpu.vector_store %arg13[%c0_56, %c0_57, %c0_58], %118 {strides = array<i32>} : memref<1x8x32xf32, #tpu.memory_space<vmem>>, vector<1x8x32xf32>,
    return
  }
  func.func @transform_0(%arg0: i32) -> (i32, i32, i32) {
    %c0_i32 = arith.constant 0 : i32
    %c0_i32_0 = arith.constant 0 : i32
    %c0_i32_1 = arith.constant 0 : i32
    return %arg0, %c0_i32, %c0_i32_0 : i32, i32, i32
  }
  func.func @transform_1(%arg0: i32) -> (i32, i32, i32) {
    %c0_i32 = arith.constant 0 : i32
    %c0_i32_0 = arith.constant 0 : i32
    %c0_i32_1 = arith.constant 0 : i32
    return %arg0, %c0_i32, %c0_i32_0 : i32, i32, i32
  }
  func.func @transform_2(%arg0: i32) -> (i32, i32, i32) {
    %c0_i32 = arith.constant 0 : i32
    %c0_i32_0 = arith.constant 0 : i32
    %c0_i32_1 = arith.constant 0 : i32
    return %arg0, %c0_i32, %c0_i32_0 : i32, i32, i32
  }
  func.func @transform_3(%arg0: i32) -> (i32, i32, i32) {
    %c0_i32 = arith.constant 0 : i32
    %c0_i32_0 = arith.constant 0 : i32
    %c0_i32_1 = arith.constant 0 : i32
    return %arg0, %c0_i32, %c0_i32_0 : i32, i32, i32
  }
  func.func @transform_4(%arg0: i32) -> (i32, i32) {
    %c0_i32 = arith.constant 0 : i32
    %c0_i32_0 = arith.constant 0 : i32
    %c0_i32_1 = arith.constant 0 : i32
    return %c0_i32, %c0_i32_0 : i32, i32
  }
  func.func @transform_5(%arg0: i32) -> (i32, i32) {
    %c0_i32 = arith.constant 0 : i32
    %c0_i32_0 = arith.constant 0 : i32
    %c0_i32_1 = arith.constant 0 : i32
    return %c0_i32, %c0_i32_0 : i32, i32
  }
  func.func @transform_6(%arg0: i32) -> (i32, i32) {
    %c0_i32 = arith.constant 0 : i32
    %c0_i32_0 = arith.constant 0 : i32
    %c0_i32_1 = arith.constant 0 : i32
    return %c0_i32, %c0_i32_0 : i32, i32
  }
  func.func @transform_7(%arg0: i32) -> (i32, i32) {
    %c0_i32 = arith.constant 0 : i32
    %c0_i32_0 = arith.constant 0 : i32
    %c0_i32_1 = arith.constant 0 : i32
    return %c0_i32, %c0_i32_0 : i32, i32
  }
  func.func @transform_8(%arg0: i32) -> (i32, i32) {
    %c0_i32 = arith.constant 0 : i32
    %c0_i32_0 = arith.constant 0 : i32
    %c0_i32_1 = arith.constant 0 : i32
    return %c0_i32, %c0_i32_0 : i32, i32
  }
  func.func @transform_9(%arg0: i32) -> (i32, i32) {
    %c0_i32 = arith.constant 0 : i32
    %c0_i32_0 = arith.constant 0 : i32
    %c0_i32_1 = arith.constant 0 : i32
    return %c0_i32, %c0_i32_0 : i32, i32
  }
  func.func @transform_10(%arg0: i32) -> (i32, i32) {
    %c0_i32 = arith.constant 0 : i32
    %c0_i32_0 = arith.constant 0 : i32
    %c0_i32_1 = arith.constant 0 : i32
    return %c0_i32, %c0_i32_0 : i32, i32
  }
  func.func @transform_11(%arg0: i32) -> (i32, i32) {
    %c0_i32 = arith.constant 0 : i32
    %c0_i32_0 = arith.constant 0 : i32
    %c0_i32_1 = arith.constant 0 : i32
    return %c0_i32, %c0_i32_0 : i32, i32
  }
  func.func @transform_12(%arg0: i32) -> (i32, i32, i32) {
    %c0_i32 = arith.constant 0 : i32
    %c0_i32_0 = arith.constant 0 : i32
    %c0_i32_1 = arith.constant 0 : i32
    return %arg0, %c0_i32, %c0_i32_0 : i32, i32, i32
  }
}

</mosaic_0001>

<bundles_post_ra>
// kernel: tpu_custom_call.1
= control target key start
LH: loop header
LB: loop body
LE: loop exit
PB: predicated region body
PF: predicated region fallthrough
CT: control target
= control target key end

     0   :  { %s3144_s0 = inlined_call_operand.hbm [shape: f32[2,8,32], index: 0, kind: input, shape index: {}]   ;;  %s3145_s1 = inlined_call_operand.hbm [shape: f32[2,8,32], index: 1, kind: input, shape index: {}]   ;;  %s3146_s2 = inlined_call_operand.hbm [shape: f32[2,8,32], index: 2, kind: input, shape index: {}]   ;;  %s3147_s3 = inlined_call_operand.vmem [shape: f32[2,8,1], index: 3, kind: input, shape index: {}]   ;;  %s3148_s4 = inlined_call_operand.hbm [shape: f32[32,32], index: 4, kind: input, shape index: {}]   ;;  %s3149_s5 = inlined_call_operand.hbm [shape: f32[1,32], index: 5, kind: input, shape index: {}]   ;;  %s3150_s6 = inlined_call_operand.hbm [shape: f32[32,32], index: 6, kind: input, shape index: {}]   ;;  %s3151_s7 = inlined_call_operand.hbm [shape: f32[1,32], index: 7, kind: input, shape index: {}]   ;;  %s3152_s8 = inlined_call_operand.vmem [shape: f32[32,32], index: 8, kind: input, shape index: {}]   ;;  %s3153_s9 = inlined_call_operand.vmem [shape: f32[1,32], index: 9, kind: input, shape index: {}]   ;;  %s3154_s10 = inlined_call_operand.hbm [shape: f32[32,32], index: 10, kind: input, shape index: {}]   ;;  %s3155_s11 = inlined_call_operand.vmem [shape: f32[1,32], index: 11, kind: input, shape index: {}]   ;;  %s3156_s12 = inlined_call_operand.hbm [shape: f32[2,8,32], index: 12, kind: output, shape index: {}]  }
   0x1   :  { %3180 = sst [smem:[#allocation29_spill]] %s3145_s1 }
   0x2   :  { %3181 = sst [smem:[#allocation30_spill]] %s3148_s4 }
   0x3   :  { %3182 = sst [smem:[#allocation31_spill]] %s3150_s6 }
   0x4   :  { %3183 = sst [smem:[#allocation32_spill]] %s3153_s9 }
   0x5   :  { %3184 = sst [smem:[#allocation33_spill]] %s3155_s11 }
   0x6   :  { %3185 = sst [smem:[#allocation34_spill]] %s3156_s12 }
   0x7   :  { %17 = vsyncpa [#allocation3], 0 }
   0x8   :  { %19 = vsyncpa [#allocation3 + $0x1], 0 }
   0x9   :  { %20 = vsyncpa [#allocation6], 0 }
   0xa   :  { %22 = vsyncpa [#allocation6 + $0x1], 0 }
   0xb   :  { %23 = vsyncpa [#allocation9], 0 }
   0xc   :  { %24 = vsyncpa [#allocation12], 0 }
   0xd   :  { %25 = vsyncpa [#allocation15], 0 }
   0xe   :  { %26 = vsyncpa [#allocation4], 0 }
   0xf   :  { %28 = vsyncpa [#allocation4 + $0x1], 0  ;;  %s2704_s21 = smov 0   ;;  %s2706_s22 = smov 0  }
  0x10   :  { %s2708_s23 = smov 0   ;;  %s2710_s24 = smov 0  }
  0x11 LB: > { %3186 = sst [smem:[#allocation23_spill]] %s2608_s21  ;;  %s2622_s25 = smov [#allocation8]   ;;  %s2620_s24 = sphi %s2710_s24, %s3228_s24   ;;  %s2616_s23 = sphi %s2708_s23, %s3232_s23   ;;  %s2612_s22 = sphi %s2706_s22, %s3231_s22   ;;  %s2608_s21 = sphi %s2704_s21, %s3230_s21  }
  0x12   : > { %3187 = sst [smem:[#allocation24_spill]] %s2620_s24  ;;  %s349_s26 = sshll.u32 %s2622_s25, 4  ;;  %s350_s26 = int_to_ptr.vmem [resolvable:$true] %s349_s26 }
  0x13   : > { %s2725_s27 = sadd.s32 4294967295, %s2620_s24   ;;  %p2011_p0 = scmp.ge.s32.totalorder %s2620_s24, 1 }
  0x14   : > { %p3169_p1 = scmp.eq.s32.totalorder %s2725_s27, 0  ;;  %p337_p2 = scmp.lt.s32.totalorder %s2620_s24, 3 }
  0x15   : > { %s2623_s29 = smov [#allocation11]   ;;  %s2337_s15 = scalar_lea.vmem %s350_s26, 512 }
  0x16   : > { %p2730_p3 = pnand %p2011_p0, %p337_p2  ;;  %s373_s30 = sshll.u32 %s2623_s29, 4  ;;  %s374_s30 = int_to_ptr.vmem [resolvable:$true] %s373_s30 }
  0x17   : > { %p2338_p8 = scmp.ne.s32.totalorder %s350_s26, %s2337_s15  ;;  %p2345_p11 = scmp.lt.s32.totalorder %s350_s26, %s350_s26 }
  0x18   : > { %s3188_s28 = scalar_select %p2730_p3, 1, 0 }
  0x19   : > { %p2222_p5 = pneg %p2730_p3  ;;  %p2346_p12 = scmp.lt.s32.totalorder %s2337_s15, %s2337_s15 }
  0x1b   : > { %p2739_p6 = pnand %p2222_p5, %p3169_p1  ;;  %p2347_p13 = por %p2346_p12, %p2345_p11 }
  0x1d   : > { %s3189_s13 = scalar_select %p2739_p6, 1, 0 }
  0x1e   : > { %p2745_p7 = pneg %p2739_p6 }
  0x20   : > { %s3190_s14 = scalar_select %p2745_p7, 1, 0 }
  0x21   : > { %p2340_p9 = pnand %p2338_p8, %p2745_p7 }
  0x23   : > { %p2341_p10 = pneg %p2340_p9 }
  0x25   : > { %p2348_p0 = pnand %p2347_p13, %p2341_p10 }
  0x27   : > { %2351 = shalt.err (!%p2348_p0)
}
  0x28   : > { %s3158_s16 = smov 128   ;;  %s3159_s17 = smov 8  }
  0x29   : > { %s3191_s4 = sld [smem:[#allocation30_spill]]  ;;  %s2363_s20 = scalar_lea.vmem %s374_s30, 512 }
  0x2a   : > { %p2364_p2 = scmp.ne.s32.totalorder %s374_s30, %s2363_s20  ;;  %p2371_p9 = scmp.lt.s32.totalorder %s374_s30, %s374_s30 }
  0x2b   : > { %p2372_p10 = scmp.lt.s32.totalorder %s2363_s20, %s2363_s20 }
  0x2c   : > { %p2366_p5 = pnand %p2364_p2, %p2745_p7 }
  0x2d   : > { %p2373_p11 = por %p2372_p10, %p2371_p9 }
  0x2e   : > { %p2367_p8 = pneg %p2366_p5 }
  0x2f   : > { %2225 = dma.hbm_to_vmem [thread:$0]  (!%p2739_p6), %s3191_s4, 512, %s350_s26, [#allocation9], %s3158_s16, %s3158_s16, %s3159_s17  }
  0x30   : > { %p2374_p12 = pnand %p2373_p11, %p2367_p8 }
  0x32   : > { %2377 = shalt.err (!%p2374_p12)
}
  0x33   : > { %s3192_s6 = sld [smem:[#allocation31_spill]]  ;;  %s2010_s26 = sadd.s32 4294967294, %s2620_s24  }
  0x34   : > { %s2771_s15 = sadd.s32 1, %s2620_s24   ;;  %s41_s19 = sadd.s32 1, %s2616_s23 }
  0x35   : > { %3193 = sst [smem:[#allocation25_spill]] %s2771_s15  ;;  %s38_s18 = ssub.s32 %s2620_s24, %s2771_s15 }
  0x36   : > { %p39_p13 = scmp.eq.s32.totalorder %s38_s18, 0  ;;  %p48_p0 = scmp.ne.s32.totalorder %s2616_s23, %s2612_s22 }
  0x37   : > { %p49_p2 = scmp.eq.s32.totalorder %s2620_s24, 0  ;;  %p54_p5 = scmp.ne.s32.totalorder %s2612_s22, %s2608_s21 }
  0x38   : > { %s2782_s20 = scalar_select %p39_p13, %s2616_s23, %s41_s19  }
  0x39   : > { %2231 = dma.hbm_to_vmem [thread:$0]  (!%p2739_p6), %s3192_s6, 512, %s374_s30, [#allocation12], %s3158_s16, %s3158_s16, %s3159_s17  }
  0x3a   : > { %3194 = sst [smem:[#allocation26_spill]] %s2782_s20  ;;  %p50_p8 = por %p49_p2, %p48_p0 }
  0x3b   : > { %p2786_p9 = por %p3169_p1, %p54_p5  ;;  %p324_p10 = scmp.eq.s32.totalorder %s2725_s27, 1 }
  0x3c   : > { %p330_p11 = scmp.eq.s32.totalorder %s2010_s26, 1  ;;  %p2257_p12 = scmp.lt.s32.totalorder %s2620_s24, 2 }
  0x3d   : > { %s3195_s25 = scalar_select %p2786_p9, 1, 0 }
  0x3e   : > { %s3160_s30 = sand.u32 1, %s2616_s23   ;;  %p2793_p4 = por %p324_p10, %p48_p0 }
  0x3f   : > { %p2797_p3 = por %p330_p11, %p54_p5  ;;  %s2803_s19 = sshll.u32 %s3160_s30, 3 }
  0x40   : > { %s3196_s29 = scalar_select %p2793_p4, 1, 0 }
  0x41   : > { %s3198_s18 = scalar_select %p2797_p3, 1, 0 }
  0x42   : > { %3197 = sst [smem:[#allocation27_spill]] %s3196_s29  ;;  %s2806_s16 = sshll.u32 %s2620_s24, 7 }
  0x43   : > { %3199 = sst [smem:[#allocation28_spill]] %s3198_s18  ;;  %p2808_p13 = pnand %p2257_p12, %p50_p8 }
  0x44   : > { %s438_s26 = sand.u32 1, %s2620_s24   ;;  %s3201_s1 = sld [smem:[#allocation29_spill]] }
  0x45   : > { %s3200_s17 = scalar_select %p2808_p13, 1, 0 }
  0x46   : > { %s442_s30 = scalar_lea.vmem [#allocation5], %s2803_s19  ;;  %s2626_s18 = smov [#allocation10]  }
  0x47   : > { %s449_s15 = sshll.u32 %s442_s30, 4  ;;  %s363_s21 = sshll.u32 %s2626_s18, 4  ;;  %s2820_s15 = int_to_ptr.vmem [resolvable:$true] %s449_s15  ;;  %s364_s21 = int_to_ptr.vmem [resolvable:$true] %s363_s21 }
  0x48   : > { %s2822_s12 = scalar_lea.sflag [#allocation6], %s438_s26  ;;  %p2828_p2 = pneg %p2808_p13 }
  0x4a   : > { %s2817_s20 = scalar_lea.hbm %s3201_s1, %s2806_s16  ;;  %s2383_s30 = scalar_lea.hbm %s3201_s1, 256 }
  0x4b   : > { %s2378_s29 = scalar_lea.hbm %s2817_s20, 128  ;;  %p2384_p10 = scmp.lt.s32.totalorder %s2817_s20, %s3201_s1 }
  0x4c   : > { %p2379_p0 = scmp.ne.s32.totalorder %s2817_s20, %s2378_s29  ;;  %p2385_p11 = scmp.lt.s32.totalorder %s2383_s30, %s2378_s29 }
  0x4d   : > { %s3202_s24 = scalar_select %p2828_p2, 1, 0 }
  0x4e   : > { %p2381_p5 = pnand %p2828_p2, %p2379_p0  ;;  %p2386_p12 = por %p2385_p11, %p2384_p10 }
  0x50   : > { %p2382_p8 = pneg %p2381_p5 }
  0x52   : > { %p2387_p1 = pnand %p2386_p12, %p2382_p8 }
  0x54   : > { %2390 = shalt.err (!%p2387_p1)
}
  0x55   : > { %s2391_s18 = scalar_lea.vmem %s2820_s15, 128  ;;  %s2627_s26 = smov [#allocation5]  }
  0x56   : > { %p2392_p3 = scmp.ne.s32.totalorder %s2820_s15, %s2391_s18  ;;  %s2396_s4 = sshll.u32 %s2627_s26, 4  ;;  %s2397_s4 = int_to_ptr.vmem [resolvable:$false] %s2396_s4 }
  0x57   : > { %s2398_s6 = scalar_lea.vmem %s2397_s4, 256  ;;  %p2399_p4 = scmp.lt.s32.totalorder %s2820_s15, %s2397_s4 }
  0x58   : > { %p2394_p0 = pnand %p2392_p3, %p2828_p2  ;;  %p2400_p9 = scmp.lt.s32.totalorder %s2398_s6, %s2391_s18 }
  0x5a   : > { %p2395_p5 = pneg %p2394_p0  ;;  %p2401_p6 = por %p2400_p9, %p2399_p4 }
  0x5c   : > { %p2402_p7 = pnand %p2401_p6, %p2395_p5 }
  0x5e   : > { %2405 = shalt.err (!%p2402_p7)
}
  0x5f   : > { %2244 = dma.hbm_to_vmem [thread:$0]  (!%p2808_p13), %s2817_s20, 128, %s2820_s15, %s2822_s12  }
  0x60   : > { %s2417_s9 = scalar_lea.vmem %s364_s21, 16  ;;  %p3203_p3 = scmp.ne.s32.totalorder %s3190_s14, 0 }
  0x61   : > { %p2418_p1 = scmp.ne.s32.totalorder %s364_s21, %s2417_s9  ;;  %s2424_s11 = scalar_lea.vmem %s364_s21, 32 }
  0x62   : > { %p2425_p11 = scmp.lt.s32.totalorder %s364_s21, %s364_s21  ;;  %p2426_p12 = scmp.lt.s32.totalorder %s2424_s11, %s2417_s9 }
  0x63   : > { %p2420_p8 = pnand %p2418_p1, %p3203_p3 }
  0x64   : > { %p2427_p0 = por %p2426_p12, %p2425_p11 }
  0x65   : > { %p2421_p10 = pneg %p2420_p8 }
  0x67   : > { %p2428_p4 = pnand %p2427_p0, %p2421_p10 }
  0x69   : > { %2431 = shalt.err (!%p2428_p4)
}
  0x6a   : > { %p3204_p6 = scmp.ne.s32.totalorder %s3189_s13, 0  ;;  %s2628_s15 = smov [#allocation13]  }
  0x6b   : > { %s387_s20 = sshll.u32 %s2628_s15, 4  ;;  %s2629_s18 = smov [#allocation14]   ;;  %s388_s20 = int_to_ptr.vmem [resolvable:$true] %s387_s20 }
  0x6c   : > { %2228 = dma.hbm_to_vmem [thread:$0]  (!%p3204_p6), %s3149_s5, 16, %s364_s21, [#allocation9]  }
  0x6d   : > { %s403_s26 = sshll.u32 %s2629_s18, 4  ;;  %s2443_s4 = scalar_lea.vmem %s388_s20, 16  ;;  %s404_s26 = int_to_ptr.vmem [resolvable:$true] %s403_s26 }
  0x6e   : > { %p2444_p7 = scmp.ne.s32.totalorder %s388_s20, %s2443_s4  ;;  %s2450_s6 = scalar_lea.vmem %s388_s20, 32 }
  0x6f   : > { %p2451_p1 = scmp.lt.s32.totalorder %s388_s20, %s388_s20  ;;  %p2452_p8 = scmp.lt.s32.totalorder %s2450_s6, %s2443_s4 }
  0x70   : > { %p2446_p9 = pnand %p2444_p7, %p3203_p3 }
  0x71   : > { %p2453_p10 = por %p2452_p8, %p2451_p1 }
  0x72   : > { %p2447_p5 = pneg %p2446_p9 }
  0x74   : > { %p2454_p11 = pnand %p2453_p10, %p2447_p5 }
  0x76   : > { %2457 = shalt.err (!%p2454_p11)
}
  0x77   : > { %2234 = dma.hbm_to_vmem [thread:$0]  (!%p3204_p6), %s3151_s7, 16, %s388_s20, [#allocation12]  }
  0x78   : > { %s2469_s11 = scalar_lea.vmem %s404_s26, 512  ;;  %p2477_p7 = scmp.lt.s32.totalorder %s404_s26, %s404_s26 }
  0x79   : > { %p2470_p12 = scmp.ne.s32.totalorder %s404_s26, %s2469_s11  ;;  %p2478_p9 = scmp.lt.s32.totalorder %s2469_s11, %s2469_s11 }
  0x7b   : > { %p2472_p0 = pnand %p2470_p12, %p3203_p3  ;;  %p2479_p13 = por %p2478_p9, %p2477_p7 }
  0x7d   : > { %p2473_p4 = pneg %p2472_p0 }
  0x7f   : > { %p2480_p2 = pnand %p2479_p13, %p2473_p4 }
  0x81   : > { %2483 = shalt.err (!%p2480_p2)
}
  0x82   : > { %s3205_s29 = smov 8   ;;  %s3206_s30 = smov 128  }
  0x83   : > { %2237 = dma.hbm_to_vmem [thread:$0]  (!%p3204_p6), %s3154_s10, 512, %s404_s26, [#allocation15], %s3206_s30, %s3206_s30, %s3205_s29  }
  0x84   : > { %s2879_s4 = scalar_lea.hbm %s3144_s0, %s2806_s16  ;;  %s424_s13 = scalar_lea.vmem [#allocation2], %s2803_s19 }
  0x85   : > { %s431_s6 = sshll.u32 %s424_s13, 4  ;;  %s2886_s11 = scalar_lea.hbm %s3146_s2, %s2806_s16  ;;  %s432_s6 = int_to_ptr.vmem [resolvable:$true] %s431_s6 }
  0x86   : > { %s3207_s15 = sand.u32 1, %s2616_s23   ;;  %s2484_s1 = scalar_lea.hbm %s2879_s4, 128 }
  0x87   : > { %s421_s18 = scalar_lea.sflag [#allocation3], %s3207_s15  ;;  %p2485_p13 = scmp.ne.s32.totalorder %s2879_s4, %s2484_s1 }
  0x88   : > { %p3208_p2 = scmp.ne.s32.totalorder %s3202_s24, 0  ;;  %s2489_s30 = scalar_lea.hbm %s3144_s0, 256 }
  0x89   : > { %p2490_p5 = scmp.lt.s32.totalorder %s2879_s4, %s3144_s0  ;;  %p2491_p1 = scmp.lt.s32.totalorder %s2489_s30, %s2484_s1 }
  0x8a   : > { %p2487_p3 = pnand %p2485_p13, %p3208_p2 }
  0x8b   : > { %p2492_p8 = por %p2491_p1, %p2490_p5 }
  0x8c   : > { %p2488_p6 = pneg %p2487_p3 }
  0x8e   : > { %p2493_p10 = pnand %p2492_p8, %p2488_p6 }
  0x90   : > { %2496 = shalt.err (!%p2493_p10)
}
  0x91   : > { %s2497_s16 = scalar_lea.vmem %s432_s6, 128  ;;  %s2630_s13 = smov [#allocation2]  }
  0x92   : > { %p2498_p11 = scmp.ne.s32.totalorder %s432_s6, %s2497_s16  ;;  %s2502_s9 = sshll.u32 %s2630_s13, 4  ;;  %s2503_s9 = int_to_ptr.vmem [resolvable:$false] %s2502_s9 }
  0x93   : > { %s2504_s21 = scalar_lea.vmem %s2503_s9, 256  ;;  %p2505_p4 = scmp.lt.s32.totalorder %s432_s6, %s2503_s9 }
  0x94   : > { %p2500_p12 = pnand %p2498_p11, %p3208_p2  ;;  %p2506_p7 = scmp.lt.s32.totalorder %s2504_s21, %s2497_s16 }
  0x96   : > { %p2501_p0 = pneg %p2500_p12  ;;  %p2507_p9 = por %p2506_p7, %p2505_p4 }
  0x98   : > { %p2508_p13 = pnand %p2507_p9, %p2501_p0 }
  0x9a   : > { %2511 = shalt.err (!%p2508_p13)
}
  0x9b   : > { %p3209_p3 = scmp.ne.s32.totalorder %s3200_s17, 0  ;;  %s460_s1 = scalar_lea.vmem [#allocation7], %s2803_s19 }
  0x9c   : > { %s467_s15 = sshll.u32 %s460_s1, 4  ;;  %s2512_s26 = scalar_lea.hbm %s2886_s11, 128  ;;  %s468_s15 = int_to_ptr.vmem [resolvable:$true] %s467_s15 }
  0x9d   : > { %2241 = dma.hbm_to_vmem [thread:$0]  (!%p3209_p3), %s2879_s4, 128, %s432_s6, %s421_s18  }
  0x9e   : > { %p2513_p6 = scmp.ne.s32.totalorder %s2886_s11, %s2512_s26  ;;  %s2517_s14 = scalar_lea.hbm %s3146_s2, 256 }
  0x9f   : > { %p2518_p8 = scmp.lt.s32.totalorder %s2886_s11, %s3146_s2  ;;  %p2519_p10 = scmp.lt.s32.totalorder %s2517_s14, %s2512_s26 }
  0xa0   : > { %p2515_p5 = pnand %p2513_p6, %p3208_p2 }
  0xa1   : > { %p2520_p11 = por %p2519_p10, %p2518_p8 }
  0xa2   : > { %p2516_p1 = pneg %p2515_p5 }
  0xa4   : > { %p2521_p12 = pnand %p2520_p11, %p2516_p1 }
  0xa6   : > { %2524 = shalt.err (!%p2521_p12)
}
  0xa7   : > { %s2525_s19 = scalar_lea.vmem %s468_s15, 128  ;;  %s2631_s4 = smov [#allocation7]  }
  0xa8   : > { %p2526_p0 = scmp.ne.s32.totalorder %s468_s15, %s2525_s19  ;;  %s2530_s6 = sshll.u32 %s2631_s4, 4  ;;  %s2531_s6 = int_to_ptr.vmem [resolvable:$false] %s2530_s6 }
  0xa9   : > { %s2532_s18 = scalar_lea.vmem %s2531_s6, 256  ;;  %p2533_p9 = scmp.lt.s32.totalorder %s468_s15, %s2531_s6 }
  0xaa   : > { %p2528_p4 = pnand %p2526_p0, %p3208_p2  ;;  %p2534_p13 = scmp.lt.s32.totalorder %s2532_s18, %s2525_s19 }
  0xac   : > { %p2529_p7 = pneg %p2528_p4  ;;  %p2535_p6 = por %p2534_p13, %p2533_p9 }
  0xae   : > { %p2536_p5 = pnand %p2535_p6, %p2529_p7 }
  0xb0   : > { %2539 = shalt.err (!%p2536_p5)
}
  0xb1   : > { %2247 = dma.hbm_to_vmem [thread:$0]  (!%p3209_p3), %s2886_s11, 128, %s468_s15, %s2822_s12  }
  0xb2   : > { %p3210_p1 = scmp.ne.s32.totalorder %s3188_s28, 0 }
  0xb3   : > { %s2927_s24 = sand.u32 (!%p3210_p1), 1, %s2612_s22   ;;  %p3211_p2 = scmp.ne.s32.totalorder (!%p3210_p1), %s3195_s25, 0 }
  0xb4   : > { %483 = sbr.rel (%p3210_p1) target bundleno = 2855 (0xb27), region = 68  ;;  %s2930_s13 = sshll.u32 (!%p3210_p1), %s2927_s24, 3 }
  0xb5   : > { %s486_s9 = scalar_lea.sflag (!%p3210_p1), [#allocation3], %s2927_s24  ;;  %s489_s21 = scalar_lea.vmem (!%p3210_p1), [#allocation2], %s2930_s13 }
  0xb9   : > { %2583 = dma.done.wait (%p3211_p2), %s486_s9, 128  }
  0xba   : > { %2585 = vsyncadd (%p3211_p2), %s486_s9, 4294967168  ;;  %s494_s12 = sand.u32 1, %s2725_s27   ;;  %s498_s17 = scalar_lea.vmem [#allocation5], %s2930_s13 }
  0xbb   : > { %s495_s28 = scalar_lea.sflag [#allocation6], %s494_s12 }
  0xbc   : > { %2587 = dma.done.wait (%p3211_p2), %s495_s28, 256  }
  0xbd   : > { %2589 = vsyncadd (%p3211_p2), %s495_s28, 4294967040  ;;  %s507_s11 = scalar_lea.vmem [#allocation7], %s2930_s13  ;;  %p3212_p3 = scmp.eq.s32.totalorder %s2725_s27, 0 }
  0xbf   : > { %2591 = dma.done.wait (%p3212_p3), [#allocation9], 528   ;;  %p3213_p8 = pmov %p3212_p3 }
  0xc0   : > { %p3214_p10 = pmov %p3212_p3 }
  0xc1   : > { %2593 = vsyncadd (%p3213_p8), [#allocation9], 4294966768 }
  0xc2   : > { %2595 = dma.done.wait (%p3214_p10), [#allocation12], 528   ;;  %p3215_p11 = pmov %p3212_p3 }
  0xc3   : > { %p3216_p12 = pmov %p3212_p3 }
  0xc4   : > { %2597 = vsyncadd (%p3215_p11), [#allocation12], 4294966768 }
  0xc5   : > { %2599 = dma.done.wait (%p3216_p12), [#allocation15], 512   ;;  %p3217_p0 = pmov %p3212_p3 }
  0xc6   : > { %v2632_v0 = vmov 0.0   ;;  %vm2633_vm0 = vmmov 0   ;;  %v597_v1 = vld [vmem:[#allocation11 + $0x18] sm:$0xff]  ;;  %v596_v3 = vld [vmem:[#allocation11 + $0x10] sm:$0xff]  ;;  %v595_v5 = vld [vmem:[#allocation11 + $0x8] sm:$0xff]  ;;  %vm613_vm1 = vcmask 261120  }
  0xc7   : > { %2601 = vsyncadd (%p3217_p0), [#allocation15], 4294966784  ;;  %2112 = vmatprep.subr.mxu1 %v2632_v0  ;;  %2101 = vmatprep.subr.mxu0 %v2632_v0  ;;  %v593_v2 = vld [vmem:[#allocation8 + $0x18] sm:$0xff]  ;;  %v592_v4 = vld [vmem:[#allocation8 + $0x10] sm:$0xff]  ;;  %p582_p4 = scmp.lt.s32.totalorder %s2725_s27, 1  ;;  %v2634_v11 = vmov 0  }
  0xc8   : > { %2120 = vmatprep.mubr.msk.f32.mxu1 %vm2633_vm0, %v2632_v0  ;;  %2109 = vmatprep.mubr.msk.f32.mxu0 %vm2633_vm0, %v2632_v0  ;;  %v591_v6 = vld [vmem:[#allocation8 + $0x8] sm:$0xff]  ;;  %v590_v8 = vld [vmem:[#allocation8] sm:$0xff]  ;;  %v586_v10 = vld [vmem:[%s489_s21] sm:$0xff]  ;;  %vm856_vm3 = vcmask 64512   ;;  %s2635_s30 = smov 120   ;;  %s3218_s28 = sld [smem:[#allocation32_spill]] }
  0xc9   : > { %2113 = vmatpush3.msra.mxu1 %v597_v1  ;;  %2102 = vmatpush3.msra.mxu0 %v593_v2  ;;  %v594_v7 = vld [vmem:[#allocation11] sm:$0xff]  ;;  %s583_s25 = scalar_select %p582_p4, %s2725_s27, 1  ;;  %v2035_v15 = vld [vmem:[#allocation10] ss:$0 sm:$0xff]  ;;  %v599_v24 = vld [vmem:[%s3152_s8 + $0x8] sm:$0xff] }
  0xca   : > { %2114 = vmatprep.subr.mxu1 %v2632_v0  ;;  %2103 = vmatprep.subr.mxu0 %v2632_v0  ;;  %v587_v9 = vld [vmem:[%s498_s17] sm:$0xff]  ;;  %v598_v25 = vld [vmem:[%s3152_s8] sm:$0xff]  ;;  %s2636_s17 = smov 112   ;;  %s3219_s15 = sld [smem:[#allocation33_spill]] }
  0xcb   : > { %2115 = vmatpush3.msra.mxu1 %v596_v3  ;;  %2104 = vmatpush3.msra.mxu0 %v592_v4  ;;  %s2034_s1 = sshll.u32 %s583_s25, 3  ;;  %v2037_v14 = vld [vmem:[#allocation13] ss:$0 sm:$0xff]  ;;  %v601_v22 = vld [vmem:[%s3152_s8 + $0x18] sm:$0xff]  ;;  %v588_v26 = vld [vmem:[%s507_s11] sm:$0xff]  ;;  %s2637_s11 = smov 104  }
  0xcc   : > { %2116 = vmatprep.subr.mxu1 %v2632_v0  ;;  %2105 = vmatprep.subr.mxu0 %v2632_v0  ;;  %s585_s29 = scalar_lea.vmem %s3147_s3, %s2034_s1  ;;  %v600_v23 = vld [vmem:[%s3152_s8 + $0x10] sm:$0xff]  ;;  %s3220_s26 = sld [smem:[#allocation27_spill]] }
  0xcd   : > { %2117 = vmatpush3.msra.mxu1 %v595_v5  ;;  %2106 = vmatpush3.msra.mxu0 %v591_v6  ;;  %v589_v12 = vld [vmem:[%s585_s29] sm:$0xff]  ;;  %v602_v42 = vld [vmem:[#allocation14] sm:$0xff]  ;;  %s2059_s29 = sshll.u32 %s2725_s27, 7  ;;  %s3221_s19 = sld [smem:[#allocation34_spill]] }
  0xce   : > { %2118 = vmatprep.subr.mxu1 %v2632_v0  ;;  %2107 = vmatprep.subr.mxu0 %v2632_v0  ;;  %vm847_vm2 = vcmp.eq.f32.partialorder %v589_v12, 0.0  ;;  %v2039_v38 = vld [vmem:[%s3218_s28] ss:$0 sm:$0xff]  ;;  %s1824_s6 = scalar_lea.sflag [#allocation4], %s2927_s24  ;;  %s2638_s27 = smov [#allocation16]  }
  0xcf   : > { %2119 = vmatpush3.msra.mxu1 %v594_v7  ;;  %2108 = vmatpush3.msra.mxu0 %v590_v8  ;;  %v848_v13 = vsel %vm847_vm2, -1e+09, %v2632_v0  ;;  %v603_v5 = vld [vmem:[#allocation14 + $0x8] sm:$0xff] }
  0xd0   : > { %2121 = vmatmul.mubr.msk.f32.vlgmr.msra.gmra.mxu1 %vm613_vm1, %v587_v9  ;;  %2110 = vmatmul.mubr.msk.f32.vlgmr.msra.gmra.mxu0 %vm613_vm1, %v586_v10 }
  0xd1   : > { %2134 = vmatprep.subr.mxu1 %v2632_v0  ;;  %2136 = vmatprep.mubr.msk.f32.mxu1 %vm2633_vm0, %v2632_v0 }
  0xd2   : > { %2123 = vmatprep.subr.mxu0 %v2632_v0  ;;  %2131 = vmatprep.mubr.msk.f32.mxu0 %vm2633_vm0, %v2632_v0  ;;  %p3222_p9 = scmp.ne.s32.totalorder %s3220_s26, 0 }
  0xd3   : > { %2309 = vset.pattern.permute.xlu0 %v2634_v11  ;;  %2124 = vmatpush3.msra.mxu0 %v601_v22  ;;  %s3106_s4 = scalar_lea.hbm %s3221_s19, %s2059_s29 }
  0xd4   : > { %936 = vperm.xlu0 %2309, %v848_v13   ;;  %2125 = vmatprep.subr.mxu0 %v2632_v0 }
  0xd5   : > { %2126 = vmatpush3.msra.mxu0 %v600_v23 }
  0xd6   : > { %2127 = vmatprep.subr.mxu0 %v2632_v0 }
  0xd7   : > { %2128 = vmatpush3.msra.mxu0 %v599_v24 }
  0xd8   : > { %2129 = vmatprep.subr.mxu0 %v2632_v0 }
  0xd9   : > { %2130 = vmatpush3.msra.mxu0 %v598_v25 }
  0xda   : > { %2132 = vmatmul.mubr.msk.f32.vlgmr.msra.gmra.mxu0 %vm613_vm1, %v588_v26  ;;  %2144 = vmatprep.subr.mxu0 %v2632_v0 }
  0xdb   : > { %2146 = vmatprep.mubr.msk.f32.mxu0 %vm2633_vm0, %v2632_v0  ;;  %2145 = vmatpush3.msra.mxu0 %v602_v42 }
  0xdc   : > { %2154 = vmatprep.subr.mxu0 %v2632_v0 }
 0x14f   : > { %v3021_v28 = vpop.permute.xlu0 %936 }
 0x190   : > { %v763_v16 = vpop.f32.mrf.mxu1  ;;  %v683_v17 = vpop.f32.mrf.mxu0 }
 0x191   : > { %v2987_v18 = vadd.f32 %v2037_v14, %v763_v16  ;;  %v2989_v19 = vadd.f32 %v2035_v15, %v683_v17 }
 0x192   : > { %v2122_v20 = vpop.f32.mrf.mxu1  ;;  %v2111_v21 = vpop.f32.mrf.mxu0 }
 0x193   : > { %1100 = vrot.lane.b32.xlu1 %v2987_v18, %s2635_s30  ;;  %2135 = vmatpush3.xpose.msk.msra.mxu1 %vm856_vm3, %v2987_v18  ;;  %v2041_v21 = vld [vmem:[%s3219_s15] ss:$0 sm:$0xff] }
 0x194   : > { %2139 = vmatprep.subr.mxu1 %v2632_v0 }
 0x196   : > { %2137 = vmatmul.mubr.msk.f32.vlgmr.msra.gmra.mxu1 %vm856_vm3, %v2989_v19 }
 0x197   : > { %2141 = vmatprep.mubr.msk.f32.mxu1 %vm2633_vm0, %v2632_v0 }
 0x19a   : > { %v843_v39 = vpop.f32.mrf.mxu0 }
 0x19b   : > { %v3029_v40 = vadd.f32 %v2039_v38, %v843_v39 }
 0x19c   : > { %v2133_v41 = vpop.f32.mrf.mxu0 }
 0x19d   : > { %2140 = vmatpush3.msra.mxu1 %v3029_v40 }
 0x19e   : > { %2149 = vmatprep.subr.mxu1 %v2632_v0 }
 0x205   : > { %v1101_v43 = vpop.permute.xlu1 %1100 }
 0x256   : > { %v929_v27 = vpop.f32.mrf.mxu1 }
 0x257   : > { %v933_v29 = vmul.f32 0.35355338, %v929_v27 }
 0x258   : > { %v2138_v30 = vpop.f32.mrf.mxu1 }
 0x259   : > { %v939_v31 = vadd.f32 %v3021_v28, %v933_v29  ;;  %v604_v30 = vld [vmem:[#allocation14 + $0x10] sm:$0xff] }
 0x25b   : > { %v940_v32 = vsel %vm856_vm3, %v939_v31, -inf }
 0x25c   : > { %941 = vmax.xlane.f32.xlu0 %v940_v32 }
 0x272   : > { %1190 = vrot.lane.b32.xlu0 %v3029_v40, %s2635_s30 }
 0x2e5   : > { %v942_v33 = vpop.xlane.xlu0 %941 }
 0x2e6   : > { %v943_v34 = vsub.f32 %v939_v31, %v942_v33 }
 0x2e8   : > { %v944_v35 = vmul.f32 1.442695, %v943_v34 }
 0x2e9   : > { %v1191_v49 = vpop.permute.xlu0 %1190 }
 0x2ea   : > { %2310 = vpow2.f32 %v944_v35 }
 0x2f7   : > { %v2311_v36 = vpop.eup %2310 }
 0x2f8   : > { %v946_v37 = vsel %vm856_vm3, %v2311_v36, 0.0 }
 0x2f9   : > { %947 = vadd.xlane.f32.xlu1 %v946_v37 }
 0x30a   : > { %1098 = vrot.lane.b32.xlu1 %v2989_v19, %s2635_s30  ;;  %s581_s30 = scalar_lea.vmem [#allocation16], %s2930_s13  ;;  %s2544_s13 = sshll.u32 %s2638_s27, 4  ;;  %s2545_s13 = int_to_ptr.vmem [resolvable:$false] %s2544_s13 }
 0x30b   : > { %s1837_s14 = sshll.u32 %s581_s30, 4  ;;  %s2546_s9 = scalar_lea.vmem %s2545_s13, 256  ;;  %s1838_s14 = int_to_ptr.vmem [resolvable:$true] %s1837_s14 }
 0x30c   : > { %s2540_s18 = scalar_lea.vmem %s1838_s14, 128  ;;  %p2547_p5 = scmp.lt.s32.totalorder %s1838_s14, %s2545_s13 }
 0x30d   : > { %p2541_p7 = scmp.ne.s32.totalorder %s1838_s14, %s2540_s18  ;;  %p2548_p1 = scmp.lt.s32.totalorder %s2546_s9, %s2540_s18 }
 0x30f   : > { %p2542_p13 = pnand %p2541_p7, %p3222_p9  ;;  %p2549_p2 = por %p2548_p1, %p2547_p5 }
 0x311   : > { %p2543_p6 = pneg %p2542_p13 }
 0x313   : > { %p2550_p3 = pnand %p2549_p2, %p2543_p6 }
 0x382   : > { %v948_v44 = vpop.xlane.xlu1 %947 }
 0x383   : > { %2312 = vrcp.f32 %v948_v44 }
 0x386   : > { %v1099_v47 = vpop.permute.xlu1 %1098 }
 0x390   : > { %v2313_v45 = vpop.eup %2312 }
 0x391   : > { %v950_v46 = vmul.f32 %v2313_v45, %v2311_v36 }
 0x393   : > { %2142 = vmatmul.mubr.msk.f32.vlgmr.msra.gmra.mxu1 %vm856_vm3, %v950_v46 }
 0x394   : > { %2150 = vmatpush3.xpose.msk.msra.mxu1 %vm856_vm3, %v1101_v43  ;;  %2151 = vmatprep.mubr.msk.f32.mxu1 %vm2633_vm0, %v2632_v0 }
 0x395   : > { %2159 = vmatprep.subr.mxu1 %v2632_v0 }
 0x397   : > { %2152 = vmatmul.mubr.msk.f32.vlgmr.msra.gmra.mxu1 %vm856_vm3, %v1099_v47 }
 0x398   : > { %2161 = vmatprep.mubr.msk.f32.mxu1 %vm2633_vm0, %v2632_v0  ;;  %2160 = vmatpush3.msra.mxu1 %v603_v5 }
 0x399   : > { %2169 = vmatprep.subr.mxu1 %v2632_v0 }
 0x453   : > { %v1020_v48 = vpop.f32.mrf.mxu1 }
 0x454   : > { %2147 = vmatmul.mubr.msk.f32.vlgmr.msra.gmra.mxu0 %vm856_vm3, %v1020_v48 }
 0x455   : > { %2155 = vmatpush3.msra.mxu0 %v1191_v49  ;;  %v2143_v50 = vpop.f32.mrf.mxu1  ;;  %2156 = vmatprep.mubr.msk.f32.mxu0 %vm2633_vm0, %v2632_v0 }
 0x456   : > { %2164 = vmatprep.subr.mxu0 %v2632_v0 }
 0x457   : > { %v1172_v51 = vpop.f32.mrf.mxu1 }
 0x458   : > { %v1176_v52 = vmul.f32 0.35355338, %v1172_v51 }
 0x459   : > { %v2153_v53 = vpop.f32.mrf.mxu1 }
 0x45a   : > { %v1177_v54 = vadd.f32 %v1176_v52, %v3021_v28 }
 0x45c   : > { %v1178_v55 = vsel %vm856_vm3, %v1177_v54, -inf }
 0x45d   : > { %1179 = vmax.xlane.f32.xlu1 %v1178_v55 }
 0x46e   : > { %1340 = vrot.lane.b32.xlu1 %v2989_v19, %s2636_s17 }
 0x4e6   : > { %v1180_v56 = vpop.xlane.xlu1 %1179 }
 0x4e7   : > { %v1181_v57 = vsub.f32 %v1177_v54, %v1180_v56 }
 0x4e9   : > { %v1182_v58 = vmul.f32 1.442695, %v1181_v57 }
 0x4ea   : > { %v1341_v4 = vpop.permute.xlu1 %1340 }
 0x4eb   : > { %2314 = vpow2.f32 %v1182_v58 }
 0x4f8   : > { %v2315_v59 = vpop.eup %2314 }
 0x4f9   : > { %v1184_v60 = vsel %vm856_vm3, %v2315_v59, 0.0 }
 0x4fa   : > { %1185 = vadd.xlane.f32.xlu0 %v1184_v60 }
 0x510   : > { %1342 = vrot.lane.b32.xlu0 %v2987_v18, %s2636_s17 }
 0x514   : > { %v1093_v61 = vpop.f32.mrf.mxu0 }
 0x516   : > { %v2148_v62 = vpop.f32.mrf.mxu0 }
 0x583   : > { %v1186_v63 = vpop.xlane.xlu0 %1185 }
 0x584   : > { %2316 = vrcp.f32 %v1186_v63 }
 0x587   : > { %v1343_v3 = vpop.permute.xlu0 %1342 }
 0x591   : > { %v2317_v1 = vpop.eup %2316 }
 0x592   : > { %v1188_v2 = vmul.f32 %v2317_v1, %v2315_v59 }
 0x594   : > { %2157 = vmatmul.mubr.msk.f32.vlgmr.msra.gmra.mxu0 %vm856_vm3, %v1188_v2 }
 0x595   : > { %2165 = vmatpush3.xpose.msk.msra.mxu0 %vm856_vm3, %v1343_v3  ;;  %2166 = vmatprep.mubr.msk.f32.mxu0 %vm2633_vm0, %v2632_v0 }
 0x596   : > { %2174 = vmatprep.subr.mxu0 %v2632_v0 }
 0x598   : > { %2167 = vmatmul.mubr.msk.f32.vlgmr.msra.gmra.mxu0 %vm856_vm3, %v1341_v4 }
 0x599   : > { %2176 = vmatprep.mubr.msk.f32.mxu0 %vm2633_vm0, %v2632_v0  ;;  %2175 = vmatpush3.msra.mxu0 %v604_v30 }
 0x59a   : > { %2184 = vmatprep.subr.mxu0 %v2632_v0 }
 0x654   : > { %v1262_v6 = vpop.f32.mrf.mxu0 }
 0x655   : > { %2162 = vmatmul.mubr.msk.f32.vlgmr.msra.gmra.mxu1 %vm856_vm3, %v1262_v6 }
 0x656   : > { %v2158_v7 = vpop.f32.mrf.mxu0  ;;  %2171 = vmatprep.mubr.msk.f32.mxu1 %vm2633_vm0, %v2632_v0 }
 0x658   : > { %v1414_v8 = vpop.f32.mrf.mxu0 }
 0x659   : > { %v1418_v9 = vmul.f32 0.35355338, %v1414_v8 }
 0x65a   : > { %v2168_v10 = vpop.f32.mrf.mxu0 }
 0x65b   : > { %v1419_v11 = vadd.f32 %v1418_v9, %v3021_v28 }
 0x65d   : > { %v1420_v12 = vsel %vm856_vm3, %v1419_v11, -inf }
 0x65e   : > { %1421 = vmax.xlane.f32.xlu0 %v1420_v12 }
 0x674   : > { %1431 = vrot.lane.b32.xlu0 %v3029_v40, %s2636_s17 }
 0x678   : > { %1581 = vrot.lane.b32.xlu0 %v2989_v19, %s2637_s11  ;;  %v1097_v19 = vadd.f32 %v2041_v21, %v1093_v61 }
 0x6e7   : > { %v1422_v13 = vpop.xlane.xlu0 %1421 }
 0x6e8   : > { %v1423_v14 = vsub.f32 %v1419_v11, %v1422_v13 }
 0x6ea   : > { %v1424_v15 = vmul.f32 1.442695, %v1423_v14 }
 0x6eb   : > { %v1432_v16 = vpop.permute.xlu0 %1431 }
 0x6ec   : > { %2318 = vpow2.f32 %v1424_v15  ;;  %2170 = vmatpush3.msra.mxu1 %v1432_v16 }
 0x6ed   : > { %2179 = vmatprep.subr.mxu1 %v2632_v0 }
 0x6f9   : > { %v2319_v17 = vpop.eup %2318 }
 0x6fa   : > { %v1426_v20 = vsel %vm856_vm3, %v2319_v17, 0.0 }
 0x6fb   : > { %1427 = vadd.xlane.f32.xlu1 %v1426_v20 }
 0x70c   : > { %1583 = vrot.lane.b32.xlu1 %v2987_v18, %s2637_s11  ;;  %v1582_v18 = vpop.permute.xlu0 %1581 }
 0x715   : > { %v1335_v22 = vpop.f32.mrf.mxu1 }
 0x716   : > { %v1339_v23 = vadd.f32 %v1335_v22, %v1097_v19 }
 0x717   : > { %v2163_v24 = vpop.f32.mrf.mxu1 }
 0x784   : > { %v1428_v25 = vpop.xlane.xlu1 %1427 }
 0x785   : > { %2320 = vrcp.f32 %v1428_v25 }
 0x788   : > { %v1584_v29 = vpop.permute.xlu1 %1583 }
 0x792   : > { %v2321_v26 = vpop.eup %2320 }
 0x793   : > { %v1430_v27 = vmul.f32 %v2321_v26, %v2319_v17 }
 0x795   : > { %2172 = vmatmul.mubr.msk.f32.vlgmr.msra.gmra.mxu1 %vm856_vm3, %v1430_v27 }
 0x796   : > { %2180 = vmatpush3.xpose.msk.msra.mxu1 %vm856_vm3, %v1584_v29  ;;  %2181 = vmatprep.mubr.msk.f32.mxu1 %vm2633_vm0, %v2632_v0 }
 0x797   : > { %2189 = vmatprep.subr.mxu1 %v2632_v0 }
 0x799   : > { %2182 = vmatmul.mubr.msk.f32.vlgmr.msra.gmra.mxu1 %vm856_vm3, %v1582_v18 }
 0x79a   : > { %2191 = vmatprep.mubr.msk.f32.mxu1 %vm2633_vm0, %v2632_v0 }
 0x855   : > { %v1503_v31 = vpop.f32.mrf.mxu1 }
 0x856   : > { %2177 = vmatmul.mubr.msk.f32.vlgmr.msra.gmra.mxu0 %vm856_vm3, %v1503_v31 }
 0x857   : > { %v2173_v32 = vpop.f32.mrf.mxu1  ;;  %2186 = vmatprep.mubr.msk.f32.mxu0 %vm2633_vm0, %v2632_v0 }
 0x859   : > { %v1655_v33 = vpop.f32.mrf.mxu1 }
 0x85a   : > { %v1659_v34 = vmul.f32 0.35355338, %v1655_v33 }
 0x85b   : > { %v2183_v35 = vpop.f32.mrf.mxu1 }
 0x85c   : > { %v1660_v36 = vadd.f32 %v1659_v34, %v3021_v28  ;;  %v605_v28 = vld [vmem:[#allocation14 + $0x18] sm:$0xff] }
 0x85d   : > { %2190 = vmatpush3.msra.mxu1 %v605_v28 }
 0x85e   : > { %v1661_v37 = vsel %vm856_vm3, %v1660_v36, -inf }
 0x85f   : > { %1662 = vmax.xlane.f32.xlu0 %v1661_v37 }
 0x875   : > { %1672 = vrot.lane.b32.xlu0 %v3029_v40, %s2637_s11 }
 0x8e8   : > { %v1663_v38 = vpop.xlane.xlu0 %1662 }
 0x8e9   : > { %v1664_v39 = vsub.f32 %v1660_v36, %v1663_v38 }
 0x8eb   : > { %v1665_v41 = vmul.f32 1.442695, %v1664_v39 }
 0x8ec   : > { %v1673_v42 = vpop.permute.xlu0 %1672 }
 0x8ed   : > { %2322 = vpow2.f32 %v1665_v41  ;;  %2185 = vmatpush3.msra.mxu0 %v1673_v42 }
 0x8fa   : > { %v2323_v43 = vpop.eup %2322 }
 0x8fb   : > { %v1667_v0 = vsel %vm856_vm3, %v2323_v43, 0.0 }
 0x8fc   : > { %1668 = vadd.xlane.f32.xlu1 %v1667_v0 }
 0x916   : > { %v1576_v44 = vpop.f32.mrf.mxu0 }
 0x917   : > { %v1580_v45 = vadd.f32 %v1576_v44, %v1339_v23 }
 0x918   : > { %v2178_v46 = vpop.f32.mrf.mxu0 }
 0x985   : > { %v1669_v47 = vpop.xlane.xlu1 %1668 }
 0x986   : > { %2324 = vrcp.f32 %v1669_v47 }
 0x993   : > { %v2325_v40 = vpop.eup %2324 }
 0x994   : > { %v1671_v48 = vmul.f32 %v2325_v40, %v2323_v43 }
 0x996   : > { %2187 = vmatmul.mubr.msk.f32.vlgmr.msra.gmra.mxu0 %vm856_vm3, %v1671_v48 }
 0xa56   : > { %v1744_v49 = vpop.f32.mrf.mxu0 }
 0xa57   : > { %2192 = vmatmul.mubr.msk.f32.vlgmr.msra.gmra.mxu1 %vm856_vm3, %v1744_v49 }
 0xa58   : > { %v2188_v50 = vpop.f32.mrf.mxu0 }
 0xb17   : > { %v1817_v51 = vpop.f32.mrf.mxu1 }
 0xb18   : > { %v1821_v52 = vadd.f32 %v1817_v51, %v1580_v45 }
 0xb19   : > { %v2193_v53 = vpop.f32.mrf.mxu1 }
 0xb1a   : > { %1822 = vst.msk [vmem:[%s581_s30] sm:$0xff] %vm613_vm1, %v1821_v52 }
 0xb1b   : > { %2553 = shalt.err (!%p2550_p3)
}
 0xb1c   : > { %s2554_s21 = scalar_lea.hbm %s3106_s4, 128  ;;  %s2558_s28 = scalar_lea.hbm %s3221_s19, 256 }
 0xb1d   : > { %p2555_p8 = scmp.ne.s32.totalorder %s3106_s4, %s2554_s21  ;;  %p2559_p12 = scmp.lt.s32.totalorder %s3106_s4, %s3221_s19 }
 0xb1e   : > { %p2560_p0 = scmp.lt.s32.totalorder %s2558_s28, %s2554_s21 }
 0xb1f   : > { %p2556_p10 = pnand %p2555_p8, %p3222_p9 }
 0xb20   : > { %p2561_p4 = por %p2560_p0, %p2559_p12 }
 0xb21   : > { %p2557_p11 = pneg %p2556_p10 }
 0xb23   : > { %p2562_p7 = pnand %p2561_p4, %p2557_p11 }
 0xb25   : > { %2565 = shalt.err (!%p2562_p7)
}
 0xb26   : > { %2220 = dma.vmem_to_hbm [thread:$0]  (%p3222_p9), %s1838_s14, 128, %s3106_s4, %s1824_s6  }
 0xb27 PF: > { %s3223_s25 = sld [smem:[#allocation23_spill]] }
 0xb28   : > { %s3224_s1 = sld [smem:[#allocation28_spill]] }
 0xb29   : > { %s3225_s15 = sld [smem:[#allocation24_spill]] }
 0xb2d   : > { %s1849_s29 = sand.u32 1, %s3223_s25  }
 0xb2e   : > { %p3226_p13 = scmp.ne.s32.totalorder %s3224_s1, 0  ;;  %s1850_s30 = scalar_lea.sflag [#allocation4], %s1849_s29 }
 0xb2f   : > { %p3227_p6 = scmp.ge.s32.totalorder %s3225_s15, 2 }
 0xb31   : > { %p2249_p5 = pnand %p3227_p6, %p3226_p13 }
 0xb33   : > { %p2250_p1 = pneg %p2249_p5 }
 0xb35   : > { %2603 = dma.done.wait (%p2250_p1), %s1850_s30, 128  }
 0xb36   : > { %2605 = vsyncadd (%p2250_p1), %s1850_s30, 4294967168  ;;  %s3228_s24 = sld [smem:[#allocation25_spill]]  ;;  %s3230_s21 = smov %s2612_s22 }
 0xb37   : > { %s3229_s20 = sld [smem:[#allocation26_spill]]  ;;  %s3231_s22 = smov %s2616_s23 }
 0xb3c   : > { %p31_p2 = scmp.ge.s32.totalorder %s3228_s24, 4  }
 0xb3d   : > { %s3232_s23 = smov %s3229_s20 }
 0xb3e   :  { %33 = sbr.rel (!%p31_p2) target bundleno = 17 (0x11), region = 160 }
 0xb43   :  { %1855 = vsyncpa [#allocation3], 1 }
 0xb44   :  { %1857 = vsyncpa [#allocation3 + $0x1], 1 }
 0xb45   :  { %1858 = vsyncpa [#allocation6], 1 }
 0xb46   :  { %1860 = vsyncpa [#allocation6 + $0x1], 1 }
 0xb47   :  { %1861 = vsyncpa [#allocation9], 1 }
 0xb48   :  { %1862 = vsyncpa [#allocation12], 1 }
 0xb49   :  { %1863 = vsyncpa [#allocation15], 1 }
 0xb4a   :  { %1864 = vsyncpa [#allocation4], 1 }
 0xb4b   :  { %1866 = vsyncpa [#allocation4 + $0x1], 1 }

</bundles_post_ra>
